<compile_context>
chip_gen: v6e
topology: v6e:2x2x1
jax: 0.10.0
libtpu: 0.0.40
codegen_flags: <defaults>
</compile_context>

<pallas_src>
import functools

import jax
import jax.numpy as jnp
from jax.experimental import pallas as pl
from jax.experimental.pallas import tpu as pltpu

LANE = 128


# ---------------------------------------------------------------------------
# Pallas kernels
# ---------------------------------------------------------------------------
def _conv_relu_pool_kernel(cols_ref, w_ref, b_ref, o_ref, *, pooled_rows):
    """One image: (4P, K) @ (K, 128) + b -> ReLU -> 2x2 maxpool -> (P, 128).

    Rows of `cols_ref` are ordered (pool_corner, h2, w2), so the maxpool is a
    4-way elementwise max of four contiguous P-row corner blocks of the f32
    accumulator held in VMEM.
    """
    acc = jnp.dot(cols_ref[...], w_ref[...], preferred_element_type=jnp.float32)
    acc = jnp.maximum(acc + b_ref[...], 0.0)
    p = pooled_rows
    pooled = jnp.maximum(
        jnp.maximum(acc[0 * p:1 * p, :], acc[1 * p:2 * p, :]),
        jnp.maximum(acc[2 * p:3 * p, :], acc[3 * p:4 * p, :]),
    )
    o_ref[...] = pooled.astype(o_ref.dtype)


def _fc_kernel(x_ref, w_ref, b_ref, o_ref):
    acc = jnp.dot(x_ref[...], w_ref[...], preferred_element_type=jnp.float32)
    o_ref[...] = (acc + b_ref[...]).astype(o_ref.dtype)


# ---------------------------------------------------------------------------
# Kernel wrappers
# ---------------------------------------------------------------------------
def conv_relu_pool(cols, w_mat, b_row, *, n_images, pooled_rows):
    """cols:(N*4*P, K)  w:(K, 128)  b:(1, 128) -> (N*P, 128) pooled activations."""
    m, k = cols.shape
    assert m == n_images * 4 * pooled_rows
    nc = w_mat.shape[1]
    kern = functools.partial(_conv_relu_pool_kernel, pooled_rows=pooled_rows)
    return pl.pallas_call(
        kern,
        out_shape=jax.ShapeDtypeStruct((n_images * pooled_rows, nc), cols.dtype),
        grid_spec=pltpu.PrefetchScalarGridSpec(
            num_scalar_prefetch=0,
            grid=(n_images,),
            in_specs=[
                pl.BlockSpec((4 * pooled_rows, k), lambda i: (i, 0)),
                pl.BlockSpec((k, nc), lambda i: (0, 0)),
                pl.BlockSpec((1, nc), lambda i: (0, 0)),
            ],
            out_specs=pl.BlockSpec((pooled_rows, nc), lambda i: (i, 0)),
        ),
        compiler_params=pltpu.CompilerParams(dimension_semantics=("parallel",)),
    )(cols, w_mat, b_row)


def fc(x, w_mat, b_row):
    """x:(N, K)  w:(K, 128)  b:(1, 128) -> (N, 128)."""
    return pl.pallas_call(
        _fc_kernel,
        out_shape=jax.ShapeDtypeStruct((x.shape[0], w_mat.shape[1]), x.dtype),
    )(x, w_mat, b_row)


# ---------------------------------------------------------------------------
# im2col with pool-friendly row ordering (small XLA glue feeding the kernels)
# ---------------------------------------------------------------------------
def im2col_pooled(x_nhwc, k=5, pad=2):
    """Patch matrix with rows ordered (n, pool_corner, h2, w2).

    Row ((n*4 + cy*2 + cx)*H2 + h2)*W2 + w2 holds the kxkxC patch for output
    pixel (2*h2 + cy, 2*w2 + cx); columns are ordered (di, dj, c_in), matching
    the OIHW -> (k*k*Cin, Cout) weight reshape.
    """
    n, h, w, c = x_nhwc.shape
    h2, w2 = h // 2, w // 2
    xp = jnp.pad(x_nhwc, ((0, 0), (pad, pad), (pad, pad), (0, 0)))
    patches = jnp.stack(
        [jnp.stack([xp[:, di:di + h, dj:dj + w, :] for dj in range(k)], axis=3)
         for di in range(k)],
        axis=3,
    )                                              # (N, H, W, k, k, C)
    p = patches.reshape(n, h2, 2, w2, 2, k * k * c)
    p = p.transpose(0, 2, 4, 1, 3, 5)              # (N, cy, cx, H2, W2, k*k*C)
    return p.reshape(n * 4 * h2 * w2, k * k * c)


# ---------------------------------------------------------------------------
# Parameter preparation (hoisted out of the forward pass, done once)
# ---------------------------------------------------------------------------
def _pad_lanes(m, lane=LANE):
    padc = (-m.shape[-1]) % lane
    if padc:
        m = jnp.pad(m, [(0, 0)] * (m.ndim - 1) + [(0, padc)])
    return m


def prepare_params(params, pooled_hw=4):
    """Reshape/permute/pad weights once so the forward pass is pure kernels."""
    w1, b1, w2, b2, wfc, bfc = params

    def conv_wb(w_oihw, b):
        cout, cin, kh, kw = w_oihw.shape
        wm = jnp.transpose(w_oihw, (2, 3, 1, 0)).reshape(kh * kw * cin, cout)
        return _pad_lanes(wm), _pad_lanes(b.reshape(1, cout)), cout

    w1m, b1r, c1 = conv_wb(w1, b1)
    w2m, b2r, c2 = conv_wb(w2, b2)

    ncls = wfc.shape[0]
    # torch flattens NCHW (channel-major); our activations flatten as (h, w, c).
    wfc_hwc = (
        wfc.reshape(ncls, c2, pooled_hw, pooled_hw)
        .transpose(0, 2, 3, 1)
        .reshape(ncls, -1)
        .T
    )                                              # (hw*hw*c2, ncls)
    wfcm = _pad_lanes(wfc_hwc)
    bfcr = _pad_lanes(bfc.reshape(1, ncls))
    return (w1m, b1r, c1), (w2m, b2r, c2), (wfcm, bfcr, ncls)


# ---------------------------------------------------------------------------
# Full model forward
# ---------------------------------------------------------------------------
def cnn_forward(x_nchw, prepared):
    (w1m, b1r, c1), (w2m, b2r, c2), (wfcm, bfcr, ncls) = prepared
    n, _, h, w = x_nchw.shape
    assert h % 4 == 0 and w % 4 == 0
    x = jnp.transpose(x_nchw, (0, 2, 3, 1))                   # NCHW -> NHWC

    # conv1 + relu + pool (one Pallas kernel)
    p1 = (h // 2) * (w // 2)
    cols1 = im2col_pooled(x)                                  # (N*4*P1, 25)
    y1 = conv_relu_pool(cols1, w1m, b1r, n_images=n, pooled_rows=p1)
    a1 = y1[:, :c1].reshape(n, h // 2, w // 2, c1)            # (N, 8, 8, 16)

    # conv2 + relu + pool (one Pallas kernel)
    p2 = (h // 4) * (w // 4)
    cols2 = im2col_pooled(a1)                                 # (N*4*P2, 400)
    y2 = conv_relu_pool(cols2, w2m, b2r, n_images=n, pooled_rows=p2)
    a2 = y2[:, :c2].reshape(n, p2 * c2)                       # (N, 512), HWC order

    # fc (one Pallas kernel), then strip the lane padding
    logits = fc(a2, wfcm, bfcr)                               # (N, 128)
    return logits[:, :ncls]                                   # (N, 10)


def cnn_reference(x_nchw, params):
    """Pure-JAX reference (mirrors the PyTorch forward), full f32 precision."""
    w1, b1, w2, b2, wfc, bfc = params
    hp = jax.lax.Precision.HIGHEST
    dn = ("NCHW", "OIHW", "NCHW")

    def pool(y):
        return jax.lax.reduce_window(
            y, -jnp.inf, jax.lax.max, (1, 1, 2, 2), (1, 1, 2, 2), "VALID"
        )

    y = jax.lax.conv_general_dilated(
        x_nchw, w1, (1, 1), [(2, 2), (2, 2)], dimension_numbers=dn, precision=hp
    )
    y = jax.nn.relu(y + b1[None, :, None, None])
    y = pool(y)
    y = jax.lax.conv_general_dilated(
        y, w2, (1, 1), [(2, 2), (2, 2)], dimension_numbers=dn, precision=hp
    )
    y = jax.nn.relu(y + b2[None, :, None, None])
    y = pool(y)
    y = y.reshape(y.shape[0], -1)
    return jnp.dot(y, wfc.T, precision=hp) + bfc


# ---------------------------------------------------------------------------
# Deterministic parameter init (PyTorch-style uniform(-1/sqrt(fan_in), ...))
# ---------------------------------------------------------------------------
def init_params(key, out_1=16, out_2=32, num_classes=10):
    ks = jax.random.split(key, 6)

    def u(k, shape, fan_in):
        bound = 1.0 / jnp.sqrt(fan_in)
        return jax.random.uniform(k, shape, jnp.float32, -bound, bound)

    w1 = u(ks[0], (out_1, 1, 5, 5), 1 * 5 * 5)
    b1 = u(ks[1], (out_1,), 1 * 5 * 5)
    w2 = u(ks[2], (out_2, out_1, 5, 5), out_1 * 5 * 5)
    b2 = u(ks[3], (out_2,), out_1 * 5 * 5)
    wfc = u(ks[4], (num_classes, out_2 * 4 * 4), out_2 * 4 * 4)
    bfc = u(ks[5], (num_classes,), out_2 * 4 * 4)
    return (w1, b1, w2, b2, wfc, bfc)


if __name__ == "__main__":
    key = jax.random.PRNGKey(0)
    k_x, k_p = jax.random.split(key)

    # fc1 expects out_2*4*4 features -> two 2x2 pools -> 16x16 input, 1 channel.
    x = jax.random.normal(k_x, (2, 1, 16, 16), dtype=jnp.float32)   # NCHW
    params = init_params(k_p)
    prepared = prepare_params(params)        # weight layout/padding done once

    out = jax.block_until_ready(cnn_forward(x, prepared))
    assert out.shape == (2, 10)

    ref = jax.block_until_ready(cnn_reference(x, params))
    # Tolerance covers default-precision (bf16 pass, f32 accumulate) MXU matmuls
    # vs. the HIGHEST-precision reference.
    assert jnp.allclose(out, ref, rtol=5e-2, atol=5e-2), "mismatch vs reference"

    print("KERNEL_OK")
</pallas_src>

<mosaic_0001>
module attributes {stable_mosaic.version = 11 : i64} {
  func.func @_conv_relu_pool_kernel(%arg0: i32, %arg1: memref<256x25xf32, #tpu.memory_space<vmem>>, %arg2: memref<25x128xf32, #tpu.memory_space<vmem>>, %arg3: memref<1x128xf32, #tpu.memory_space<vmem>>, %arg4: memref<64x128xf32, #tpu.memory_space<vmem>>) attributes {dimension_semantics = [#tpu.dimension_semantics<parallel>], iteration_bounds = array<i64: 2>, scalar_prefetch = 0 : i64, scratch_operands = 0 : i64, tpu.core_type = #tpu.core_type<tc>, window_params = [{transform_indices = @transform_0, window_bounds = array<i64: 256, 25>}, {pipeline_mode = #tpu.pipeline_mode<synchronous>, transform_indices = @transform_1, window_bounds = array<i64: 25, 128>}, {pipeline_mode = #tpu.pipeline_mode<synchronous>, transform_indices = @transform_2, window_bounds = array<i64: 1, 128>}, {transform_indices = @transform_3, window_bounds = array<i64: 64, 128>}]} {
    %c0 = arith.constant 0 : index
    %c0_0 = arith.constant 0 : index
    %0 = vector.load %arg1[%c0, %c0_0] : memref<256x25xf32, #tpu.memory_space<vmem>>, vector<256x25xf32>
    %c0_1 = arith.constant 0 : index
    %c0_2 = arith.constant 0 : index
    %1 = vector.load %arg2[%c0_1, %c0_2] : memref<25x128xf32, #tpu.memory_space<vmem>>, vector<25x128xf32>
    %cst = arith.constant dense<0.000000e+00> : vector<256x128xf32>
    %2 = tpu.matmul %0, %1, %cst {dimension_numbers = #tpu.dot_dimension_numbers<[1], [0], [0], [1], [0, 0, 1, 1], [], []>} : vector<256x25xf32>, vector<25x128xf32>, vector<256x128xf32> -> vector<256x128xf32>
    %c0_3 = arith.constant 0 : index
    %c0_4 = arith.constant 0 : index
    %3 = vector.load %arg3[%c0_3, %c0_4] : memref<1x128xf32, #tpu.memory_space<vmem>>, vector<1x128xf32>
    %4 = vector.broadcast %3 : vector<1x128xf32> to vector<256x128xf32>
    %5 = arith.addf %2, %4 : vector<256x128xf32>
    %cst_5 = arith.constant 0.000000e+00 : f32
    %6 = vector.broadcast %cst_5 : f32 to vector<256x128xf32>
    %7 = arith.maximumf %5, %6 : vector<256x128xf32>
    %8 = vector.extract_strided_slice %7 {offsets = [0, 0], sizes = [64, 128], strides = [1, 1]} : vector<256x128xf32> to vector<64x128xf32>
    %9 = vector.extract_strided_slice %7 {offsets = [64, 0], sizes = [64, 128], strides = [1, 1]} : vector<256x128xf32> to vector<64x128xf32>
    %10 = arith.maximumf %8, %9 : vector<64x128xf32>
    %11 = vector.extract_strided_slice %7 {offsets = [128, 0], sizes = [64, 128], strides = [1, 1]} : vector<256x128xf32> to vector<64x128xf32>
    %12 = vector.extract_strided_slice %7 {offsets = [192, 0], sizes = [64, 128], strides = [1, 1]} : vector<256x128xf32> to vector<64x128xf32>
    %13 = arith.maximumf %11, %12 : vector<64x128xf32>
    %14 = arith.maximumf %10, %13 : vector<64x128xf32>
    %c0_6 = arith.constant 0 : index
    %c0_7 = arith.constant 0 : index
    %15 = vector.load %arg4[%c0_6, %c0_7] : memref<64x128xf32, #tpu.memory_space<vmem>>, vector<64x128xf32>
    tpu.vector_store %arg4[%c0_6, %c0_7], %14 {strides = array<i32>} : memref<64x128xf32, #tpu.memory_space<vmem>>, vector<64x128xf32>,
    return
  }
  func.func @transform_0(%arg0: i32) -> (i32, i32) {
    %c0_i32 = arith.constant 0 : i32
    %c0_i32_0 = arith.constant 0 : i32
    return %arg0, %c0_i32 : i32, i32
  }
  func.func @transform_1(%arg0: i32) -> (i32, i32) {
    %c0_i32 = arith.constant 0 : i32
    %c0_i32_0 = arith.constant 0 : i32
    %c0_i32_1 = arith.constant 0 : i32
    return %c0_i32, %c0_i32_0 : i32, i32
  }
  func.func @transform_2(%arg0: i32) -> (i32, i32) {
    %c0_i32 = arith.constant 0 : i32
    %c0_i32_0 = arith.constant 0 : i32
    %c0_i32_1 = arith.constant 0 : i32
    return %c0_i32, %c0_i32_0 : i32, i32
  }
  func.func @transform_3(%arg0: i32) -> (i32, i32) {
    %c0_i32 = arith.constant 0 : i32
    %c0_i32_0 = arith.constant 0 : i32
    return %arg0, %c0_i32 : i32, i32
  }
}

</mosaic_0001>

<bundles_post_ra>
// kernel: tpu_custom_call.1
= control target key start
LH: loop header
LB: loop body
LE: loop exit
PB: predicated region body
PF: predicated region fallthrough
CT: control target
= control target key end

     0   :  { %8 = vsyncpa [#allocation3], 0  ;;  %s1215_s0 = inlined_call_operand.vmem [shape: f32[512,25], index: 0, kind: input, shape index: {}]   ;;  %s1216_s1 = inlined_call_operand.vmem [shape: f32[25,128], index: 1, kind: input, shape index: {}]   ;;  %s1217_s2 = inlined_call_operand.vmem [shape: f32[1,128], index: 2, kind: input, shape index: {}]   ;;  %s1218_s3 = inlined_call_operand.hbm [shape: f32[128,128], index: 3, kind: output, shape index: {}]  }
   0x1   :  { %10 = vsyncpa [#allocation3 + $0x1], 0  ;;  %s954_s12 = smov 0   ;;  %s956_s13 = smov 0  }
   0x2   :  { %s958_s14 = smov 0   ;;  %s960_s15 = smov 0  }
   0x3 LB: > { %s975_s16 = sadd.s32 4294967295, %s929_s15   ;;  %s681_s17 = sadd.s32 4294967294, %s929_s15   ;;  %s929_s15 = sphi %s960_s15, %s1224_s15   ;;  %s925_s14 = sphi %s958_s14, %s1223_s14   ;;  %s921_s13 = sphi %s956_s13, %s1222_s13   ;;  %s917_s12 = sphi %s954_s12, %s1221_s12  }
   0x4   : > { %s979_s18 = sadd.s32 1, %s929_s15   ;;  %s91_s19 = sadd.s32 1, %s925_s14 }
   0x5   : > { %s88_s20 = ssub.s32 %s929_s15, %s979_s18  ;;  %p101_p0 = scmp.ne.s32.totalorder %s925_s14, %s921_s13 }
   0x6   : > { %p89_p1 = scmp.eq.s32.totalorder %s88_s20, 0  ;;  %p102_p2 = scmp.eq.s32.totalorder %s975_s16, 1 }
   0x7   : > { %p107_p3 = scmp.ne.s32.totalorder %s921_s13, %s917_s12  ;;  %p108_p4 = scmp.eq.s32.totalorder %s681_s17, 1 }
   0x8   : > { %s990_s21 = scalar_select %p89_p1, %s925_s14, %s91_s19  }
   0x9   : > { %p992_p5 = por %p102_p2, %p101_p0  ;;  %p996_p6 = por %p108_p4, %p107_p3 }
   0xa   : > { %p684_p7 = scmp.ge.s32.totalorder %s929_s15, 1  ;;  %p141_p8 = scmp.lt.s32.totalorder %s929_s15, 3 }
   0xc   : > { %p142_p9 = pnand %p684_p7, %p141_p8 }
   0xd   : > { %s686_s28 = sshll.u32 (!%p142_p9), %s975_s16, 5  ;;  %s162_s17 = sand.u32 (!%p142_p9), 1, %s921_s13  }
   0xe   : > { %145 = sbr.rel (%p142_p9) target bundleno = 275 (0x113), region = 32  ;;  %p166_p10 = scmp.lt.s32.totalorder (!%p142_p9), %s686_s28, 63 }
   0xf   : > { %s685_s19 = sshll.u32 (!%p142_p9), %s162_s17, 6  ;;  %s727_s24 = sshll.u32 (!%p142_p9), %s975_s16, 10 }
  0x10   : > { %s1142_s20 = scalar_lea.vmem (!%p142_p9), [#allocation2], %s685_s19  ;;  %s1175_s16 = scalar_lea.sflag (!%p142_p9), [#allocation3], %s162_s17 }
  0x11   : > { %s619_s25 = sshll.u32 (!%p142_p9), %s1142_s20, 4  ;;  %s931_s30 = smov (!%p142_p9), [#allocation2]   ;;  %s1169_s25 = int_to_ptr.vmem [resolvable:$true] %s619_s25 }
  0x12   : > { %s869_s29 = scalar_lea.vmem (!%p142_p9), %s1169_s25, 1024  ;;  %s873_s4 = sshll.u32 (!%p142_p9), %s931_s30, 4  ;;  %s874_s4 = int_to_ptr.vmem [resolvable:$false] %s873_s4 }
  0x13   : > { %v207_v0 = vld [vmem:[%s1216_s1 + $0x18] sm:$0x1]  ;;  %vm312_vm0 = vcmask 1040384   ;;  %v206_v1 = vld [vmem:[%s1216_s1 + $0x10] sm:$0xff]  ;;  %v205_v2 = vld [vmem:[%s1216_s1 + $0x8] sm:$0xff]  ;;  %s1226_s28 = smov (!%p166_p10, %s686_s28), 63  ;;  %p870_p11 = scmp.ne.s32.totalorder %s1169_s25, %s869_s29 }
  0x14   : > { %764 = vmatprep.subr.msk.mxu0 %vm312_vm0, %v207_v0  ;;  %820 = vmatprep.subr.msk.mxu1 %vm312_vm0, %v207_v0  ;;  %v204_v3 = vld [vmem:[%s1216_s1] sm:$0xff]  ;;  %s687_s6 = sshll.u32 %s1226_s28, 3  ;;  %vm215_vm1 = vcmask 203776   ;;  %s1167_s28 = scalar_lea.hbm %s1218_s3, %s727_s24 }
  0x15   : > { %765 = vmatpush3.msk.msra.mxu0 %vm312_vm0, %v207_v0  ;;  %824 = vmatpush3.msk.msra.mxu1 %vm312_vm0, %v207_v0  ;;  %s1018_s9 = scalar_lea.vmem %s1215_s0, %s687_s6  ;;  %v1087_v44 = vld [vmem:[%s1217_s2] ss:$0 sm:$0xff]  ;;  %p871_p12 = pnand %p870_p11, %p992_p5 }
  0x16   : > { %766 = vmatprep.subr.mxu0 %v206_v1  ;;  %821 = vmatprep.subr.mxu1 %v206_v1  ;;  %v172_v4 = vld [vmem:[%s1018_s9] sm:$0xff]  ;;  %v173_v6 = vld [vmem:[%s1018_s9 + $0x8] sm:$0xff]  ;;  %v174_v8 = vld [vmem:[%s1018_s9 + $0x10] sm:$0xff]  ;;  %s875_s5 = scalar_lea.vmem %s874_s4, 2048  ;;  %p876_p0 = scmp.lt.s32.totalorder %s1169_s25, %s874_s4 }
  0x17   : > { %767 = vmatpush3.msra.mxu0 %v206_v1  ;;  %825 = vmatpush3.msra.mxu1 %v206_v1  ;;  %v188_v5 = vld [vmem:[%s1018_s9 + $0x80] sm:$0xff]  ;;  %v189_v7 = vld [vmem:[%s1018_s9 + $0x88] sm:$0xff]  ;;  %v190_v9 = vld [vmem:[%s1018_s9 + $0x90] sm:$0xff]  ;;  %p872_p13 = pneg %p871_p12  ;;  %p877_p1 = scmp.lt.s32.totalorder %s875_s5, %s869_s29 }
  0x18   : > { %768 = vmatprep.subr.mxu0 %v205_v2  ;;  %822 = vmatprep.subr.mxu1 %v205_v2  ;;  %v175_v10 = vld [vmem:[%s1018_s9 + $0x18] sm:$0xff]  ;;  %v176_v12 = vld [vmem:[%s1018_s9 + $0x20] sm:$0xff]  ;;  %v177_v14 = vld [vmem:[%s1018_s9 + $0x28] sm:$0xff] }
  0x19   : > { %769 = vmatpush3.msra.mxu0 %v205_v2  ;;  %826 = vmatpush3.msra.mxu1 %v205_v2  ;;  %v191_v11 = vld [vmem:[%s1018_s9 + $0x98] sm:$0xff]  ;;  %v192_v13 = vld [vmem:[%s1018_s9 + $0xa0] sm:$0xff]  ;;  %v193_v15 = vld [vmem:[%s1018_s9 + $0xa8] sm:$0xff]  ;;  %p878_p2 = por %p877_p1, %p876_p0 }
  0x1a   : > { %770 = vmatprep.subr.mxu0 %v204_v3  ;;  %823 = vmatprep.subr.mxu1 %v204_v3  ;;  %v178_v16 = vld [vmem:[%s1018_s9 + $0x30] sm:$0xff]  ;;  %v179_v18 = vld [vmem:[%s1018_s9 + $0x38] sm:$0xff]  ;;  %v180_v20 = vld [vmem:[%s1018_s9 + $0x40] sm:$0xff] }
  0x1b   : > { %771 = vmatpush3.msra.mxu0 %v204_v3  ;;  %827 = vmatpush3.msra.mxu1 %v204_v3  ;;  %v194_v17 = vld [vmem:[%s1018_s9 + $0xb0] sm:$0xff]  ;;  %v195_v19 = vld [vmem:[%s1018_s9 + $0xb8] sm:$0xff]  ;;  %v196_v21 = vld [vmem:[%s1018_s9 + $0xc0] sm:$0xff]  ;;  %p879_p3 = pnand %p878_p2, %p872_p13 }
  0x1c   : > { %772 = vmatprep.mubr.msk.f32.mxu0 %vm215_vm1, %v172_v4  ;;  %796 = vmatprep.mubr.msk.f32.mxu1 %vm215_vm1, %v188_v5  ;;  %v181_v22 = vld [vmem:[%s1018_s9 + $0x48] sm:$0xff]  ;;  %v182_v24 = vld [vmem:[%s1018_s9 + $0x50] sm:$0xff]  ;;  %v183_v26 = vld [vmem:[%s1018_s9 + $0x58] sm:$0xff] }
  0x1d   : > { %773 = vmatmul.mubr.msk.f32.vlgmr.msra.gmra.mxu0 %vm215_vm1, %v173_v6  ;;  %797 = vmatmul.mubr.msk.f32.vlgmr.msra.gmra.mxu1 %vm215_vm1, %v189_v7  ;;  %v197_v23 = vld [vmem:[%s1018_s9 + $0xc8] sm:$0xff]  ;;  %v198_v25 = vld [vmem:[%s1018_s9 + $0xd0] sm:$0xff]  ;;  %v199_v27 = vld [vmem:[%s1018_s9 + $0xd8] sm:$0xff] }
  0x1e   : > { %775 = vmatprep.mubr.msk.f32.mxu0 %vm215_vm1, %v174_v8  ;;  %799 = vmatprep.mubr.msk.f32.mxu1 %vm215_vm1, %v190_v9  ;;  %v184_v28 = vld [vmem:[%s1018_s9 + $0x60] sm:$0xff]  ;;  %v185_v30 = vld [vmem:[%s1018_s9 + $0x68] sm:$0xff]  ;;  %v186_v32 = vld [vmem:[%s1018_s9 + $0x70] sm:$0xff] }
  0x1f   : > { %v200_v29 = vld [vmem:[%s1018_s9 + $0xe0] sm:$0xff]  ;;  %v201_v31 = vld [vmem:[%s1018_s9 + $0xe8] sm:$0xff]  ;;  %v202_v33 = vld [vmem:[%s1018_s9 + $0xf0] sm:$0xff] }
  0x20   : > { %v187_v34 = vld [vmem:[%s1018_s9 + $0x78] sm:$0xff] }
  0x21   : > { %776 = vmatmul.mubr.msk.f32.gmra.mxu0 %vm215_vm1, %v175_v10  ;;  %800 = vmatmul.mubr.msk.f32.gmra.mxu1 %vm215_vm1, %v191_v11  ;;  %v203_v35 = vld [vmem:[%s1018_s9 + $0xf8] sm:$0xff] }
  0x22   : > { %778 = vmatprep.mubr.msk.f32.mxu0 %vm215_vm1, %v176_v12  ;;  %802 = vmatprep.mubr.msk.f32.mxu1 %vm215_vm1, %v192_v13 }
  0x25   : > { %779 = vmatmul.mubr.msk.f32.gmra.mxu0 %vm215_vm1, %v177_v14  ;;  %803 = vmatmul.mubr.msk.f32.gmra.mxu1 %vm215_vm1, %v193_v15 }
  0x26   : > { %781 = vmatprep.mubr.msk.f32.mxu0 %vm215_vm1, %v178_v16  ;;  %805 = vmatprep.mubr.msk.f32.mxu1 %vm215_vm1, %v194_v17 }
  0x29   : > { %782 = vmatmul.mubr.msk.f32.gmra.mxu0 %vm215_vm1, %v179_v18  ;;  %806 = vmatmul.mubr.msk.f32.gmra.mxu1 %vm215_vm1, %v195_v19 }
  0x2a   : > { %784 = vmatprep.mubr.msk.f32.mxu0 %vm215_vm1, %v180_v20  ;;  %808 = vmatprep.mubr.msk.f32.mxu1 %vm215_vm1, %v196_v21 }
  0x2d   : > { %785 = vmatmul.mubr.msk.f32.gmra.mxu0 %vm215_vm1, %v181_v22  ;;  %809 = vmatmul.mubr.msk.f32.gmra.mxu1 %vm215_vm1, %v197_v23 }
  0x2e   : > { %787 = vmatprep.mubr.msk.f32.mxu0 %vm215_vm1, %v182_v24  ;;  %811 = vmatprep.mubr.msk.f32.mxu1 %vm215_vm1, %v198_v25 }
  0x31   : > { %788 = vmatmul.mubr.msk.f32.gmra.mxu0 %vm215_vm1, %v183_v26  ;;  %812 = vmatmul.mubr.msk.f32.gmra.mxu1 %vm215_vm1, %v199_v27 }
  0x32   : > { %790 = vmatprep.mubr.msk.f32.mxu0 %vm215_vm1, %v184_v28  ;;  %814 = vmatprep.mubr.msk.f32.mxu1 %vm215_vm1, %v200_v29 }
  0x35   : > { %791 = vmatmul.mubr.msk.f32.gmra.mxu0 %vm215_vm1, %v185_v30  ;;  %815 = vmatmul.mubr.msk.f32.gmra.mxu1 %vm215_vm1, %v201_v31 }
  0x36   : > { %793 = vmatprep.mubr.msk.f32.mxu0 %vm215_vm1, %v186_v32  ;;  %817 = vmatprep.mubr.msk.f32.mxu1 %vm215_vm1, %v202_v33 }
  0x39   : > { %794 = vmatmul.mubr.msk.f32.gmra.mxu0 %vm215_vm1, %v187_v34  ;;  %818 = vmatmul.mubr.msk.f32.gmra.mxu1 %vm215_vm1, %v203_v35 }
  0xdd   : > { %v774_v36 = vpop.f32.mrf.mxu0  ;;  %v798_v37 = vpop.f32.mrf.mxu1 }
  0xde   : > { %v388_v49 = vadd.f32 %v774_v36, %v1087_v44  ;;  %v468_v50 = vadd.f32 %v798_v37, %v1087_v44 }
  0xdf   : > { %v382_v38 = vpop.f32.mrf.mxu0  ;;  %v462_v39 = vpop.f32.mrf.mxu1 }
  0xe0   : > { %v383_v53 = vadd.f32 %v1087_v44, %v382_v38  ;;  %v463_v54 = vadd.f32 %v1087_v44, %v462_v39  ;;  %v542_v60 = vmax.f32 %v388_v49, 0.0  ;;  %v558_v61 = vmax.f32 %v468_v50, 0.0 }
  0xe1   : > { %v777_v40 = vpop.f32.mrf.mxu0  ;;  %v801_v41 = vpop.f32.mrf.mxu1 }
  0xe2   : > { %v1094_v55 = vadd.f32 %v777_v40, %v1087_v44  ;;  %v1097_v56 = vadd.f32 %v801_v41, %v1087_v44  ;;  %v541_v4 = vmax.f32 %v383_v53, 0.0  ;;  %v557_v5 = vmax.f32 %v463_v54, 0.0 }
  0xe3   : > { %v392_v42 = vpop.f32.mrf.mxu0  ;;  %v472_v43 = vpop.f32.mrf.mxu1 }
  0xe4   : > { %v1100_v57 = vadd.f32 %v1087_v44, %v392_v42  ;;  %v1107_v62 = vadd.f32 %v1087_v44, %v472_v43  ;;  %v544_v8 = vmax.f32 %v1094_v55, 0.0  ;;  %v560_v9 = vmax.f32 %v1097_v56, 0.0 }
  0xe5   : > { %v780_v45 = vpop.f32.mrf.mxu0  ;;  %v804_v46 = vpop.f32.mrf.mxu1 }
  0xe6   : > { %v1110_v63 = vadd.f32 %v780_v45, %v1087_v44  ;;  %v1113_v0 = vadd.f32 %v804_v46, %v1087_v44  ;;  %v543_v10 = vmax.f32 %v1100_v57, 0.0  ;;  %v559_v18 = vmax.f32 %v1107_v62, 0.0 }
  0xe7   : > { %v402_v47 = vpop.f32.mrf.mxu0  ;;  %v482_v48 = vpop.f32.mrf.mxu1 }
  0xe8   : > { %v1116_v1 = vadd.f32 %v1087_v44, %v402_v47  ;;  %v1125_v11 = vadd.f32 %v1087_v44, %v482_v48  ;;  %v546_v19 = vmax.f32 %v1110_v63, 0.0  ;;  %v562_v20 = vmax.f32 %v1113_v0, 0.0 }
  0xe9   : > { %v783_v51 = vpop.f32.mrf.mxu0  ;;  %v807_v52 = vpop.f32.mrf.mxu1 }
  0xea   : > { %v545_v21 = vmax.f32 %v1116_v1, 0.0  ;;  %v561_v28 = vmax.f32 %v1125_v11, 0.0  ;;  %v418_v29 = vadd.f32 %v783_v51, %v1087_v44  ;;  %v498_v38 = vadd.f32 %v807_v52, %v1087_v44 }
  0xeb   : > { %v1102_v58 = vpop.f32.mrf.mxu0  ;;  %v1104_v59 = vpop.f32.mrf.mxu1 }
  0xec   : > { %v548_v49 = vmax.f32 %v418_v29, 0.0 }
  0xed   : > { %v786_v2 = vpop.f32.mrf.mxu0  ;;  %v810_v3 = vpop.f32.mrf.mxu1 }
  0xee   : > { %v428_v6 = vadd.f32 %v786_v2, %v1087_v44  ;;  %v508_v7 = vadd.f32 %v810_v3, %v1087_v44 }
  0xef   : > { %v422_v12 = vpop.f32.mrf.mxu0  ;;  %v502_v13 = vpop.f32.mrf.mxu1 }
  0xf0   : > { %v550_v14 = vmax.f32 %v428_v6, 0.0  ;;  %v566_v15 = vmax.f32 %v508_v7, 0.0  ;;  %v423_v16 = vadd.f32 %v1087_v44, %v422_v12  ;;  %v503_v17 = vadd.f32 %v1087_v44, %v502_v13 }
  0xf1   : > { %v789_v22 = vpop.f32.mrf.mxu0  ;;  %v813_v23 = vpop.f32.mrf.mxu1  ;;  %v493_v7 = vadd.f32 %v1087_v44, %v1104_v59 }
  0xf2   : > { %v574_v24 = vmax.f32 %v542_v60, %v550_v14  ;;  %v582_v25 = vmax.f32 %v558_v61, %v566_v15  ;;  %v549_v26 = vmax.f32 %v423_v16, 0.0  ;;  %v565_v27 = vmax.f32 %v503_v17, 0.0 }
  0xf3   : > { %v438_v30 = vadd.f32 %v789_v22, %v1087_v44  ;;  %v518_v31 = vadd.f32 %v813_v23, %v1087_v44  ;;  %v432_v32 = vpop.f32.mrf.mxu0  ;;  %v512_v33 = vpop.f32.mrf.mxu1  ;;  %v413_v61 = vadd.f32 %v1087_v44, %v1102_v58  ;;  %v564_v16 = vmax.f32 %v498_v38, 0.0 }
  0xf4   : > { %v590_v34 = vmax.f32 %v574_v24, %v582_v25  ;;  %v573_v35 = vmax.f32 %v541_v4, %v549_v26  ;;  %v581_v36 = vmax.f32 %v557_v5, %v565_v27  ;;  %v433_v37 = vadd.f32 %v1087_v44, %v432_v32 }
  0xf5   : > { %v552_v39 = vmax.f32 %v438_v30, 0.0  ;;  %v568_v40 = vmax.f32 %v518_v31, 0.0  ;;  %v513_v41 = vadd.f32 %v1087_v44, %v512_v33  ;;  %v792_v42 = vpop.f32.mrf.mxu0  ;;  %v816_v43 = vpop.f32.mrf.mxu1 }
  0xf6   : > { %598 = vst [vmem:[%s1142_s20 + $0x8] sm:$0xff] %v590_v34  ;;  %v589_v45 = vmax.f32 %v573_v35, %v581_v36  ;;  %v551_v46 = vmax.f32 %v433_v37, 0.0  ;;  %v448_v47 = vadd.f32 %v792_v42, %v1087_v44  ;;  %v528_v48 = vadd.f32 %v816_v43, %v1087_v44 }
  0xf7   : > { %v576_v50 = vmax.f32 %v544_v8, %v552_v39  ;;  %v584_v51 = vmax.f32 %v560_v9, %v568_v40  ;;  %v567_v52 = vmax.f32 %v513_v41, 0.0  ;;  %v442_v53 = vpop.f32.mrf.mxu0  ;;  %v522_v54 = vpop.f32.mrf.mxu1 }
  0xf8   : > { %597 = vst [vmem:[%s1142_s20] sm:$0xff] %v589_v45  ;;  %v575_v55 = vmax.f32 %v543_v10, %v551_v46  ;;  %v554_v56 = vmax.f32 %v448_v47, 0.0  ;;  %v570_v57 = vmax.f32 %v528_v48, 0.0  ;;  %v443_v60 = vadd.f32 %v1087_v44, %v442_v53 }
  0xf9   : > { %v592_v62 = vmax.f32 %v576_v50, %v584_v51  ;;  %v583_v63 = vmax.f32 %v559_v18, %v567_v52  ;;  %v523_v0 = vadd.f32 %v1087_v44, %v522_v54  ;;  %v795_v1 = vpop.f32.mrf.mxu0  ;;  %v819_v2 = vpop.f32.mrf.mxu1 }
  0xfa   : > { %v578_v3 = vmax.f32 %v546_v19, %v554_v56  ;;  %v586_v4 = vmax.f32 %v562_v20, %v570_v57  ;;  %v553_v5 = vmax.f32 %v443_v60, 0.0  ;;  %v458_v6 = vadd.f32 %v795_v1, %v1087_v44 }
  0xfb   : > { %600 = vst [vmem:[%s1142_s20 + $0x18] sm:$0xff] %v592_v62  ;;  %v591_v8 = vmax.f32 %v575_v55, %v583_v63  ;;  %v569_v9 = vmax.f32 %v523_v0, 0.0  ;;  %v538_v58 = vadd.f32 %v819_v2, %v1087_v44  ;;  %v452_v10 = vpop.f32.mrf.mxu0  ;;  %v532_v11 = vpop.f32.mrf.mxu1  ;;  %v547_v19 = vmax.f32 %v413_v61, 0.0 }
  0xfc   : > { %v594_v12 = vmax.f32 %v578_v3, %v586_v4  ;;  %v577_v13 = vmax.f32 %v545_v21, %v553_v5  ;;  %v556_v14 = vmax.f32 %v458_v6, 0.0  ;;  %v453_v15 = vadd.f32 %v1087_v44, %v452_v10 }
  0xfd   : > { %599 = vst [vmem:[%s1142_s20 + $0x10] sm:$0xff] %v591_v8  ;;  %v585_v17 = vmax.f32 %v561_v28, %v569_v9  ;;  %v572_v59 = vmax.f32 %v538_v58, 0.0  ;;  %v533_v18 = vadd.f32 %v1087_v44, %v532_v11  ;;  %v563_v21 = vmax.f32 %v493_v7, 0.0 }
  0xfe   : > { %602 = vst [vmem:[%s1142_s20 + $0x28] sm:$0xff] %v594_v12  ;;  %v580_v20 = vmax.f32 %v548_v49, %v556_v14  ;;  %v555_v22 = vmax.f32 %v453_v15, 0.0 }
  0xff   : > { %v593_v23 = vmax.f32 %v577_v13, %v585_v17  ;;  %v588_v24 = vmax.f32 %v564_v16, %v572_v59  ;;  %v571_v25 = vmax.f32 %v533_v18, 0.0 }
 0x100   : > { %v579_v26 = vmax.f32 %v547_v19, %v555_v22 }
 0x101   : > { %601 = vst [vmem:[%s1142_s20 + $0x20] sm:$0xff] %v593_v23  ;;  %v596_v27 = vmax.f32 %v580_v20, %v588_v24  ;;  %v587_v28 = vmax.f32 %v563_v21, %v571_v25 }
 0x103   : > { %604 = vst [vmem:[%s1142_s20 + $0x38] sm:$0xff] %v596_v27  ;;  %v595_v44 = vmax.f32 %v579_v26, %v587_v28 }
 0x105   : > { %603 = vst [vmem:[%s1142_s20 + $0x30] sm:$0xff] %v595_v44 }
 0x106   : > { %882 = shalt.err (!%p879_p3)
}
 0x107   : > { %s883_s6 = scalar_lea.hbm %s1167_s28, 1024  ;;  %s887_s9 = scalar_lea.hbm %s1218_s3, 2048 }
 0x108   : > { %p884_p4 = scmp.ne.s32.totalorder %s1167_s28, %s883_s6  ;;  %p888_p9 = scmp.lt.s32.totalorder %s1167_s28, %s1218_s3 }
 0x109   : > { %p889_p10 = scmp.lt.s32.totalorder %s887_s9, %s883_s6 }
 0x10a   : > { %p885_p7 = pnand %p884_p4, %p992_p5 }
 0x10b   : > { %p890_p11 = por %p889_p10, %p888_p9 }
 0x10c   : > { %p886_p8 = pneg %p885_p7 }
 0x10e   : > { %p891_p12 = pnand %p890_p11, %p886_p8 }
 0x110   : > { %894 = shalt.err (!%p891_p12)
}
 0x111   : > { %s932_s17 = smov 128   ;;  %s933_s19 = smov 8  }
 0x112   : > { %828 = dma.vmem_to_hbm [thread:$0]  (%p992_p5), %s1169_s25, 1024, %s1167_s28, %s1175_s16, %s932_s17, %s932_s17, %s933_s19  }
 0x113 PF: > { %p834_p13 = scmp.ge.s32.totalorder %s929_s15, 2  ;;  %s634_s20 = sand.u32 1, %s917_s12  }
 0x114   : > { %s635_s24 = scalar_lea.sflag [#allocation3], %s634_s20 }
 0x115   : > { %p831_p0 = pnand %p834_p13, %p996_p6 }
 0x117   : > { %p832_p1 = pneg %p831_p0 }
 0x119   : > { %912 = dma.done.wait (%p832_p1), %s635_s24, 1024  }
 0x11a   : > { %914 = vsyncadd (%p832_p1), %s635_s24, 4294966272  ;;  %p13_p2 = scmp.ge.s32.totalorder %s979_s18, 4   ;;  %s1221_s12 = smov %s921_s13 }
 0x11b   : > { %s1222_s13 = smov %s925_s14  ;;  %s1223_s14 = smov %s990_s21 }
 0x11c   : > { %s1224_s15 = smov %s979_s18  ;;  %15 = sbr.rel (!%p13_p2) target bundleno = 3 (0x3), region = 67 }
 0x121   :  { %640 = vsyncpa [#allocation3], 1 }
 0x122   :  { %642 = vsyncpa [#allocation3 + $0x1], 1 }

</bundles_post_ra>
